<compile_context>
chip_gen: v7x
topology: tpu7x:2x2x1
jax: 0.10.0
libtpu: 0.0.40
codegen_flags: <defaults>
</compile_context>

<pallas_src>
import jax
import jax.numpy as jnp
from jax.experimental import pallas as pl
from jax.experimental.pallas import tpu as pltpu

EPS = 1e-6  # matches torch.Tensor([1e-06]) in the module __init__
LANES = 128


def _charbonnier(x, y):
    x = x.astype(jnp.float32)
    y = y.astype(jnp.float32)
    d = x - y
    return jnp.sqrt(d * d + EPS)


def _sublane_multiple(*dtypes):
    """Sublane packing multiple: 8 for 4-byte, 16 for 2-byte, 32 for 1-byte dtypes."""
    sm = 8
    for dt in dtypes:
        itemsize = jnp.dtype(dt).itemsize
        sm = max(sm, 8 * max(1, 4 // itemsize))
    return sm


def _default_tile_config():
    """(block_rows, vmem_limit_bytes) sized for the current TPU generation."""
    # Universal-safe default: 8192 rows -> 4 MiB/input/block (f32), ~16 MiB
    # resident double-buffered; a 40 MiB scoped-VMEM limit fits v5e/v6e
    # (128 MiB physical) and v7x (64 MiB physical) alike.
    block_rows, vmem_limit = 8192, 40 * 1024 * 1024
    try:
        info = pltpu.get_tpu_info()
        vmem_cap = getattr(info, "vmem_capacity_bytes", None)
        if vmem_cap is not None and vmem_cap <= 80 * 1024 * 1024:
            # v7x-class (64 MiB VMEM, ~3.2 TB/s HBM): larger steps hide the
            # per-step overhead; 32 MiB resident + 48 MiB limit keeps >=16 MiB
            # headroom of the 64 MiB physical VMEM.
            block_rows, vmem_limit = 16384, 48 * 1024 * 1024
    except Exception:
        pass
    return block_rows, vmem_limit


def _make_kernel(block_rows, needs_mask, valid_rows_last):
    """Kernel factory; all arguments are static Python ints/bools."""
    groups = block_rows // 8  # block_rows is always a multiple of 8

    def _fold(err):
        # (block_rows, 128) -> (1, 8, 128): whole-vreg VPU adds only; the
        # expensive cross-lane/sublane reduce is deferred to the tiny epilogue.
        return err.reshape(groups, 8, LANES).sum(axis=0).reshape(1, 8, LANES)

    def kernel(x_ref, y_ref, out_ref):
        err = _charbonnier(x_ref[...], y_ref[...])

        if not needs_mask:
            out_ref[...] = _fold(err)
        else:
            i = pl.program_id(0)
            last = pl.num_programs(0) - 1

            @pl.when(i != last)
            def _():
                out_ref[...] = _fold(err)

            @pl.when(i == last)
            def _():
                # Only the final (partial) block pays for the mask. Per-row mask:
                # (block_rows, 1) iota, broadcast across lanes by jnp.where, so
                # NaN/Inf from the unspecified tail rows cannot leak into the sum.
                row_ids = jax.lax.broadcasted_iota(jnp.int32, (block_rows, 1), 0)
                masked = jnp.where(row_ids < valid_rows_last, err, 0.0)
                out_ref[...] = _fold(masked)

    return kernel


def l1_charbonnier_loss(x, y, block_rows=None, vmem_limit_bytes=None):
    """mean(sqrt((x - y)^2 + eps)) — exact semantics of the PyTorch module."""
    assert x.shape == y.shape
    n = x.size

    auto_rows, auto_vmem = _default_tile_config()
    if block_rows is None:
        block_rows = auto_rows
    if vmem_limit_bytes is None:
        vmem_limit_bytes = auto_vmem

    sm = _sublane_multiple(x.dtype, y.dtype)
    block_rows = max(sm, pl.cdiv(block_rows, sm) * sm)  # dtype-tile aligned

    xf = jnp.ravel(x)  # zero-copy for contiguous inputs
    yf = jnp.ravel(y)

    rows_valid = n // LANES
    n_main = rows_valid * LANES
    rem = n - n_main

    total = jnp.zeros((), jnp.float32)

    if rem:
        # <128-element ragged remainder: tiny plain-JAX tail, never a full pad.
        total = total + jnp.sum(_charbonnier(xf[n_main:], yf[n_main:]))

    if rows_valid > 0:
        if rem:
            # TODO(synk): this prefix slice costs one extra HBM copy of each
            # input when n % 128 != 0; a zero-copy variant needs a 1-D BlockSpec
            # with an in-kernel (K,) -> (K//128, 128) reshape of each block.
            x2 = xf[:n_main].reshape(rows_valid, LANES)
            y2 = yf[:n_main].reshape(rows_valid, LANES)
        else:
            x2 = xf.reshape(rows_valid, LANES)  # no copy, no pad
            y2 = yf.reshape(rows_valid, LANES)

        # Clamp the tile for small inputs; keep it a multiple of the dtype's
        # sublane packing so bf16/int8 never hit a sub-minimum tile.
        block_rows_eff = min(block_rows, pl.cdiv(rows_valid, sm) * sm)
        num_blocks = pl.cdiv(rows_valid, block_rows_eff)
        needs_mask = (rows_valid % block_rows_eff) != 0
        valid_rows_last = rows_valid - (num_blocks - 1) * block_rows_eff

        kernel = _make_kernel(block_rows_eff, needs_mask, valid_rows_last)

        partials = pl.pallas_call(
            kernel,
            out_shape=jax.ShapeDtypeStruct((num_blocks, 8, LANES), jnp.float32),
            grid=(num_blocks,),
            in_specs=[
                pl.BlockSpec((block_rows_eff, LANES), lambda i: (i, 0)),
                pl.BlockSpec((block_rows_eff, LANES), lambda i: (i, 0)),
            ],
            out_specs=pl.BlockSpec((1, 8, LANES), lambda i: (i, 0, 0)),
            # Independent blocks -> "parallel" axis; on v7x this lets megacore
            # shard blocks across both TensorCores.
            # TODO(synk): if profiling on v7x shows only one TC streaming, switch
            # to pltpu.CORE_PARALLEL (and/or cap block_rows so num_blocks >= 4);
            # pl.Buffered(3) on the input specs is a further option if DMA stays exposed.
            compiler_params=pltpu.CompilerParams(
                dimension_semantics=("parallel",),
                vmem_limit_bytes=int(vmem_limit_bytes),
            ),
        )(x2, y2)

        # Tiny epilogue: cross-block + cross-lane/sublane reduction in plain JAX.
        total = total + jnp.sum(partials)

    return total / jnp.float32(n)


if __name__ == "__main__":
    key = jax.random.PRNGKey(0)
    kx, ky = jax.random.split(key)

    # NCHW inputs, as the PyTorch module would receive.
    x = jax.random.normal(kx, (2, 4, 16, 16), dtype=jnp.float32)
    y = jax.random.normal(ky, (2, 4, 16, 16), dtype=jnp.float32)
    loss = l1_charbonnier_loss(x, y)
    jax.block_until_ready(loss)
    ref = jnp.mean(jnp.sqrt((x - y) ** 2 + EPS))
    assert jnp.allclose(loss, ref, rtol=1e-5, atol=1e-6), (loss, ref)

    # Ragged size: exercises the masked last block (rows % 8 != 0) and the
    # <128-element plain-JAX tail.
    xr = jax.random.normal(kx, (2, 7, 123), dtype=jnp.float32)
    yr = jax.random.normal(ky, (2, 7, 123), dtype=jnp.float32)
    loss_r = l1_charbonnier_loss(xr, yr)
    jax.block_until_ready(loss_r)
    ref_r = jnp.mean(jnp.sqrt((xr - yr) ** 2 + EPS))
    assert jnp.allclose(loss_r, ref_r, rtol=1e-5, atol=1e-6), (loss_r, ref_r)

    print("KERNEL_OK")
</pallas_src>

<mosaic_0001>
module attributes {stable_mosaic.version = 11 : i64} {
  func.func @kernel(%arg0: i32, %arg1: memref<16x128xf32, #tpu.memory_space<vmem>>, %arg2: memref<16x128xf32, #tpu.memory_space<vmem>>, %arg3: memref<1x8x128xf32, #tpu.memory_space<vmem>>) attributes {dimension_semantics = [#tpu.dimension_semantics<parallel>], iteration_bounds = array<i64: 1>, scalar_prefetch = 0 : i64, scratch_operands = 0 : i64, tpu.core_type = #tpu.core_type<tc>, window_params = [{transform_indices = @transform_0, window_bounds = array<i64: 16, 128>}, {transform_indices = @transform_1, window_bounds = array<i64: 16, 128>}, {transform_indices = @transform_2, window_bounds = array<i64: 1, 8, 128>}]} {
    %c0 = arith.constant 0 : index
    %c0_0 = arith.constant 0 : index
    %0 = vector.load %arg1[%c0, %c0_0] : memref<16x128xf32, #tpu.memory_space<vmem>>, vector<16x128xf32>
    %c0_1 = arith.constant 0 : index
    %c0_2 = arith.constant 0 : index
    %1 = vector.load %arg2[%c0_1, %c0_2] : memref<16x128xf32, #tpu.memory_space<vmem>>, vector<16x128xf32>
    %2 = arith.subf %0, %1 : vector<16x128xf32>
    %3 = arith.mulf %2, %2 : vector<16x128xf32>
    %cst = arith.constant 9.99999997E-7 : f32
    %4 = vector.broadcast %cst : f32 to vector<16x128xf32>
    %5 = arith.addf %3, %4 : vector<16x128xf32>
    %6 = math.sqrt %5 : vector<16x128xf32>
    %7 = vector.shape_cast %6 : vector<16x128xf32> to vector<2x8x128xf32>
    %cst_3 = arith.constant dense<0.000000e+00> : vector<8x128xf32>
    %8 = vector.multi_reduction <add>, %7, %cst_3 [0] : vector<2x8x128xf32> to vector<8x128xf32>
    %9 = vector.shape_cast %8 : vector<8x128xf32> to vector<1x8x128xf32>
    %c0_4 = arith.constant 0 : index
    %c0_5 = arith.constant 0 : index
    %c0_6 = arith.constant 0 : index
    %10 = vector.load %arg3[%c0_4, %c0_5, %c0_6] : memref<1x8x128xf32, #tpu.memory_space<vmem>>, vector<1x8x128xf32>
    tpu.vector_store %arg3[%c0_4, %c0_5, %c0_6], %9 {strides = array<i32>} : memref<1x8x128xf32, #tpu.memory_space<vmem>>, vector<1x8x128xf32>,
    return
  }
  func.func @transform_0(%arg0: i32) -> (i32, i32) {
    %c0_i32 = arith.constant 0 : i32
    %c0_i32_0 = arith.constant 0 : i32
    return %arg0, %c0_i32 : i32, i32
  }
  func.func @transform_1(%arg0: i32) -> (i32, i32) {
    %c0_i32 = arith.constant 0 : i32
    %c0_i32_0 = arith.constant 0 : i32
    return %arg0, %c0_i32 : i32, i32
  }
  func.func @transform_2(%arg0: i32) -> (i32, i32, i32) {
    %c0_i32 = arith.constant 0 : i32
    %c0_i32_0 = arith.constant 0 : i32
    %c0_i32_1 = arith.constant 0 : i32
    return %arg0, %c0_i32, %c0_i32_0 : i32, i32, i32
  }
}

</mosaic_0001>

<bundles_post_ra>
// kernel: tpu_custom_call.1
= control target key start
LH: loop header
LB: loop body
LE: loop exit
PB: predicated region body
PF: predicated region fallthrough
CT: control target
= control target key end

     0   :  { %7 = vsyncpa [#allocation3], 0  ;;  %s219_s0 = inlined_call_operand.hbm [shape: f32[16,128], index: 0, kind: input, shape index: {}]   ;;  %s220_s1 = inlined_call_operand.hbm [shape: f32[16,128], index: 1, kind: input, shape index: {}]   ;;  %s221_s2 = inlined_call_operand.hbm [shape: f32[1,8,128], index: 2, kind: output, shape index: {}]  }
   0x1   :  { %8 = vsyncpa [#allocation6], 0 }
   0x2   :  { %9 = vsyncpa [#allocation4], 0  ;;  %s163_s9 = smov [#allocation2]   ;;  %s91_s13 = scalar_lea.hbm %s219_s0, 256 }
   0x3   :  { %s15_s10 = sshll.u32 %s163_s9, 4  ;;  %p92_p0 = scmp.ne.s32.totalorder %s219_s0, %s91_s13  ;;  %s16_s10 = int_to_ptr.vmem [resolvable:$true] %s15_s10 }
   0x4   :  { %p95_p1 = scmp.lt.u32.totalorder %s91_s13, %s219_s0 }
   0x6   :  { %p97_p2 = pnand %p95_p1, %p92_p0 }
   0x8   :  { %100 = shalt.err (!%p97_p2)
}
   0x9   :  { %s101_s18 = scalar_lea.vmem %s16_s10, 256  ;;  %p106_p4 = scmp.lt.s32.totalorder %s16_s10, %s16_s10 }
   0xa   :  { %p102_p3 = scmp.ne.s32.totalorder %s16_s10, %s101_s18  ;;  %p107_p5 = scmp.lt.s32.totalorder %s101_s18, %s101_s18 }
   0xc   :  { %p108_p6 = por %p107_p5, %p106_p4 }
   0xe   :  { %p109_p7 = pnand %p108_p6, %p102_p3 }
  0x10   :  { %112 = shalt.err (!%p109_p7)
}
  0x11   :  { %s164_s19 = smov 128   ;;  %s165_s20 = smov 8  }
  0x12   :  { %21 = dma.hbm_to_vmem [thread:$0]  %s219_s0, 256, %s16_s10, [#allocation3], %s164_s19, %s164_s19, %s165_s20  }
  0x13   :  { %s166_s23 = smov [#allocation5]   ;;  %s113_s27 = scalar_lea.hbm %s220_s1, 256 }
  0x14   :  { %s27_s24 = sshll.u32 %s166_s23, 4  ;;  %p114_p8 = scmp.ne.s32.totalorder %s220_s1, %s113_s27  ;;  %s28_s24 = int_to_ptr.vmem [resolvable:$true] %s27_s24 }
  0x15   :  { %p117_p9 = scmp.lt.u32.totalorder %s113_s27, %s220_s1 }
  0x17   :  { %p119_p10 = pnand %p117_p9, %p114_p8 }
  0x19   :  { %122 = shalt.err (!%p119_p10)
}
  0x1a   :  { %s123_s4 = scalar_lea.vmem %s28_s24, 256  ;;  %p128_p12 = scmp.lt.s32.totalorder %s28_s24, %s28_s24 }
  0x1b   :  { %p124_p11 = scmp.ne.s32.totalorder %s28_s24, %s123_s4  ;;  %p129_p13 = scmp.lt.s32.totalorder %s123_s4, %s123_s4 }
  0x1d   :  { %p130_p0 = por %p129_p13, %p128_p12 }
  0x1f   :  { %p131_p1 = pnand %p130_p0, %p124_p11 }
  0x21   :  { %134 = shalt.err (!%p131_p1)
}
  0x22   :  { %33 = dma.hbm_to_vmem [thread:$0]  %s220_s1, 256, %s28_s24, [#allocation6], %s164_s19, %s164_s19, %s165_s20  }
  0x23   :  { %157 = dma.done.wait [#allocation3], 256  }
  0x24   :  { %158 = vsyncadd [#allocation3], 4294967040 }
  0x25   :  { %159 = dma.done.wait [#allocation6], 256  }
  0x26   :  { %160 = vsyncadd [#allocation6], 4294967040  ;;  %v40_v0 = vld [vmem:[#allocation2] sm:$0xff]  ;;  %v41_v1 = vld [vmem:[#allocation2 + $0x8] sm:$0xff]  ;;  %s167_s1 = smov [#allocation7]  }
  0x27   :  { %v42_v2 = vld [vmem:[#allocation5] sm:$0xff]  ;;  %v43_v3 = vld [vmem:[#allocation5 + $0x8] sm:$0xff]  ;;  %s72_s6 = sshll.u32 %s167_s1, 4  ;;  %s73_s6 = int_to_ptr.vmem [resolvable:$true] %s72_s6 }
  0x28   :  { %v44_v4 = vsub.f32 %v40_v0, %v42_v2  ;;  %v45_v5 = vsub.f32 %v41_v1, %v43_v3  ;;  %s135_s7 = scalar_lea.vmem %s73_s6, 128  ;;  %p140_p3 = scmp.lt.s32.totalorder %s73_s6, %s73_s6 }
  0x29   :  { %p136_p2 = scmp.ne.s32.totalorder %s73_s6, %s135_s7  ;;  %p141_p4 = scmp.lt.s32.totalorder %s135_s7, %s135_s7 }
  0x2a   :  { %v46_v6 = vmul.f32 %v44_v4, %v44_v4  ;;  %v47_v7 = vmul.f32 %v45_v5, %v45_v5 }
  0x2b   :  { %p142_p5 = por %p141_p4, %p140_p3 }
  0x2c   :  { %v48_v8 = vadd.f32 1e-06, %v46_v6  ;;  %v49_v9 = vadd.f32 1e-06, %v47_v7 }
  0x2d   :  { %p143_p6 = pnand %p142_p5, %p136_p2 }
  0x2e   :  { %87 = vrsqrt.f32 %v48_v8  ;;  %vm52_vm0 = vcmp.eq.f32.partialorder %v48_v8, inf  ;;  %v55_v11 = vand.u32 2147483648, %v48_v8  ;;  %vm54_vm1 = vcmp.eq.f32.partialorder %v48_v8, 0.0 }
  0x2f   :  { %89 = vrsqrt.f32 %v49_v9  ;;  %vm59_vm2 = vcmp.eq.f32.partialorder %v49_v9, inf  ;;  %v62_v14 = vand.u32 2147483648, %v49_v9  ;;  %vm61_vm3 = vcmp.eq.f32.partialorder %v49_v9, 0.0 }
  0x38   :  { %v88_v10 = vpop.eup %87 }
  0x39   :  { %v90_v12 = vpop.eup %89  ;;  %v51_v13 = vmul.f32 %v88_v10, %v48_v8 }
  0x3a   :  { %v58_v15 = vmul.f32 %v90_v12, %v49_v9 }
  0x3b   :  { %v53_v16 = vsel %vm52_vm0, %v48_v8, %v51_v13 }
  0x3c   :  { %v56_v17 = vsel %vm54_vm1, %v55_v11, %v53_v16  ;;  %v60_v18 = vsel %vm59_vm2, %v49_v9, %v58_v15 }
  0x3d   :  { %v63_v19 = vsel %vm61_vm3, %v62_v14, %v60_v18 }
  0x3e   :  { %v64_v20 = vadd.f32 %v63_v19, %v56_v17 }
  0x40   :  { %65 = vst [vmem:[#allocation7] sm:$0xff] %v64_v20 }
  0x41   :  { %146 = shalt.err (!%p143_p6)
}
  0x42   :  { %s147_s10 = scalar_lea.hbm %s221_s2, 128 }
  0x43   :  { %p148_p7 = scmp.ne.s32.totalorder %s221_s2, %s147_s10  ;;  %p151_p8 = scmp.lt.u32.totalorder %s147_s10, %s221_s2 }
  0x45   :  { %p153_p9 = pnand %p151_p8, %p148_p7 }
  0x47   :  { %156 = shalt.err (!%p153_p9)
}
  0x48   :  { %75 = dma.vmem_to_hbm [thread:$0]  %s73_s6, 128, %s221_s2, [#allocation4]  }
  0x49   :  { %161 = dma.done.wait [#allocation4], 128  }
  0x4a   :  { %162 = vsyncadd [#allocation4], 4294967168 }
  0x4b   :  { %79 = vsyncpa [#allocation3], 1 }
  0x4c   :  { %80 = vsyncpa [#allocation6], 1 }
  0x4d   :  { %81 = vsyncpa [#allocation4], 1 }

</bundles_post_ra>
